<compile_context>
chip_gen: v6e
topology: v6e:2x2x1
jax: 0.10.0
libtpu: 0.0.40
codegen_flags: <defaults>
</compile_context>

<pallas_src>
import math
from functools import partial

import jax
import jax.numpy as jnp
from jax.experimental import pallas as pl
from jax.experimental.pallas import tpu as pltpu


# ----------------------------- Pallas kernel ------------------------------ #
def _proj_kernel(x_ref, w_ref, b_ref, o_ref):
    # x_ref: (TR, K)   rows of the (reshaped) signal, K taps per row
    # w_ref: (Q,  K)   (block-diagonal) projection weight
    # b_ref: (Q,  1)   bias, broadcast over lanes
    # o_ref: (Q, TR)   lane-dense output tile (lane dim = TR)
    acc = jax.lax.dot_general(
        w_ref[...], x_ref[...],
        dimension_numbers=(((1,), (1,)), ((), ())),   # contract the K taps
        preferred_element_type=jnp.float32,
    )
    o_ref[...] = (acc + b_ref[...]).astype(o_ref.dtype)


def _pick_tile(rows, batch, max_tile):
    """Tile along the row axis: a multiple-of-128 divisor of `rows` (so the
    output needs no padding / tail slice), else the full axis.  Prefers >= 2
    total grid steps so v7x megacore keeps both TensorCores busy."""
    if rows % 128 != 0:
        return rows
    hi = min(rows, max(max_tile, 128))
    divs = [d for d in range(128, hi + 1, 128) if rows % d == 0]
    if not divs:
        return rows
    tile = divs[-1]
    if batch * (rows // tile) < 2 and len(divs) >= 2:
        tile = divs[-2]
    return tile


def _proj_matmul(xb, wmat, bvec, *, max_tile):
    """out[b, q, r] = sum_k wmat[q, k] * xb[b, r, k] + bvec[q]."""
    B, R, K = xb.shape
    Q = wmat.shape[0]
    tile = _pick_tile(R, B, max_tile)
    grid = (B, R // tile)
    return pl.pallas_call(
        _proj_kernel,
        out_shape=jax.ShapeDtypeStruct((B, Q, R), jnp.float32),
        grid_spec=pltpu.PrefetchScalarGridSpec(
            num_scalar_prefetch=0,
            grid=grid,
            in_specs=[
                pl.BlockSpec((None, tile, K), lambda b, r: (b, r, 0)),  # signal rows
                pl.BlockSpec((Q, K), lambda b, r: (0, 0)),              # weight (const)
                pl.BlockSpec((Q, 1), lambda b, r: (0, 0)),              # bias   (const)
            ],
            out_specs=pl.BlockSpec((None, Q, tile), lambda b, r: (b, 0, r)),
        ),
        compiler_params=pltpu.CompilerParams(
            dimension_semantics=("parallel", "parallel")),
    )(xb, wmat, bvec.reshape(Q, 1))


# ------------------------------- wrapper ----------------------------------- #
@partial(jax.jit, static_argnames=("max_tile",))
def downsampling_embed_forward(x, weight, bias, *, max_tile=2048):
    """Forward of DownsamplingEmbed.

    x:      (B, C, W) float32
    weight: (Cout, 1, P) Conv1d weight layout
    bias:   (Cout,)
    returns (B, Cout, L) with L = (C*W - P)//P + 1, matching PyTorch exactly.
    """
    B, C, W = x.shape
    Cout, _, P = weight.shape
    N = C * W
    L = (N - P) // P + 1                      # conv1d VALID output length, stride=P
    flat = x.reshape(B, N)
    if L * P != N:                            # conv drops the tail remainder
        flat = flat[:, : L * P]
    w2 = weight.reshape(Cout, P)

    if L % Cout == 0:
        # ---- fused fast path (the intended configuration) ----
        # Signal rows are (Cout*P) wide; a block-diagonal (Cout^2, Cout*P)
        # weight makes row z*Cout + c of the result equal conv[b, c, e*Cout+z],
        # which is exactly the final PyTorch layout: only a free metadata
        # reshape remains outside the kernel.
        E = L // Cout
        xb = flat.reshape(B, E, Cout * P)
        wbig = jnp.einsum("zy,cp->zcyp",
                          jnp.eye(Cout, dtype=w2.dtype), w2)
        wbig = wbig.reshape(Cout * Cout, Cout * P)
        bbig = jnp.tile(bias, Cout)           # bbig[z*Cout + c] = bias[c]
        out = _proj_matmul(xb, wbig, bbig, max_tile=max_tile)  # (B, Cout^2, E)
        return out.reshape(B, Cout, Cout * E)                  # free reshape

    # ---- generic fallback (L % Cout != 0): conv layout + exact PyTorch tail ----
    # Still lane-dense output (lane dim = L); the extra XLA permutation pass
    # only happens on this rare ragged configuration.
    xb = flat.reshape(B, L, P)
    conv = _proj_matmul(xb, w2, bias, max_tile=max_tile)        # (B, Cout, L)
    return conv.reshape(B, L, Cout).transpose(0, 2, 1)


# -------------------------- parameter construction ------------------------ #
def init_downsampling_embed_params(signal_size, patch_size, in_chans,
                                   embed_dim, use_mean, key):
    """Mirrors DownsamplingEmbed.__init__ deterministically."""
    assert signal_size % patch_size == 0, \
        "patchembedding size must be signal_size // patch_size"
    P = signal_size // embed_dim              # module overwrites patch_size
    if use_mean:
        weight = jnp.ones((in_chans, 1, P), jnp.float32)      # nn.init.ones_
    else:
        # nn.init.dirac_ on (in_chans, 1, P): min(out, in)=1 => only channel 0
        # gets a 1 at the centre tap; all other output channels are zero.
        weight = jnp.zeros((in_chans, 1, P), jnp.float32)
        weight = weight.at[0, 0, P // 2].set(1.0)
    # Conv1d default bias init: U(-sqrt(k), sqrt(k)), k = 1/(in_ch*kernel)
    k = 1.0 / (1 * P)
    bias = jax.random.uniform(key, (in_chans,), jnp.float32,
                              minval=-math.sqrt(k), maxval=math.sqrt(k))
    return weight, bias, P


# ------------------------------ pure-JAX ref ------------------------------ #
def ref_forward(x, weight, bias):
    B, C, W = x.shape
    Cout, _, P = weight.shape
    flat = x.reshape(B, 1, C * W)
    y = jax.lax.conv_general_dilated(
        flat, weight, window_strides=(P,), padding="VALID",
        dimension_numbers=("NCH", "OIH", "NCH"))
    y = y + bias.reshape(1, Cout, 1)
    y = y.reshape(B, -1, Cout).transpose(0, 2, 1)
    return y


def _check(y, y_ref, tol):
    assert y.shape == y_ref.shape, (y.shape, y_ref.shape)
    err = float(jnp.max(jnp.abs(y - y_ref)))
    assert err <= tol, err


if __name__ == "__main__":
    key = jax.random.PRNGKey(0)
    (kx, kb, kw2, kb2, kx3, kw3, kb3,
     kx4, kw4, kb4, kx5, kw5, kb5) = jax.random.split(key, 13)

    # -- config 1: module-faithful init (dirac kernel + Conv1d bias init) ----
    #    signal_size=64, patch_size(arg)=16, in_chans=4, embed_dim=16 -> P=4, L=64
    signal_size, patch_size_arg, in_chans, embed_dim, B = 64, 16, 4, 16, 2
    weight, bias, P = init_downsampling_embed_params(
        signal_size, patch_size_arg, in_chans, embed_dim,
        use_mean=False, key=kb)
    x = jax.random.normal(kx, (B, in_chans, signal_size), jnp.float32)
    y = jax.block_until_ready(downsampling_embed_forward(x, weight, bias))
    y_ref = jax.block_until_ready(ref_forward(x, weight, bias))
    _check(y, y_ref, 1e-5)

    # -- config 2: same shapes, random weights (stresses the fused layout) ----
    w_rnd = jax.random.normal(kw2, weight.shape, jnp.float32)
    b_rnd = jax.random.normal(kb2, bias.shape, jnp.float32)
    y2 = jax.block_until_ready(downsampling_embed_forward(x, w_rnd, b_rnd))
    y2_ref = jax.block_until_ready(ref_forward(x, w_rnd, b_rnd))
    _check(y2, y2_ref, 1e-4)

    # -- config 3: bigger, batch-parallel grid (grid=(2,1)) -------------------
    #    signal_size=256, in_chans=8, embed_dim=64 -> P=4, L=512, E=64
    sig3, chans3, emb3 = 256, 8, 64
    w3 = jax.random.normal(kw3, (chans3, 1, sig3 // emb3), jnp.float32)
    b3 = jax.random.normal(kb3, (chans3,), jnp.float32)
    x3 = jax.random.normal(kx5, (B, chans3, sig3), jnp.float32)
    y3 = jax.block_until_ready(downsampling_embed_forward(x3, w3, b3))
    y3_ref = jax.block_until_ready(ref_forward(x3, w3, b3))
    _check(y3, y3_ref, 1e-4)

    # -- config 4: E divisible by 128 -> tiled lane-dense output, grid=(2,2) --
    #    signal_size=512, in_chans=4, embed_dim=256 -> P=2, L=1024, E=256
    sig4, chans4, emb4 = 512, 4, 256
    w4 = jax.random.normal(kw4, (chans4, 1, sig4 // emb4), jnp.float32)
    b4 = jax.random.normal(kb4, (chans4,), jnp.float32)
    x4 = jax.random.normal(kx4, (B, chans4, sig4), jnp.float32)
    y4 = jax.block_until_ready(
        downsampling_embed_forward(x4, w4, b4, max_tile=128))
    y4_ref = jax.block_until_ready(ref_forward(x4, w4, b4))
    _check(y4, y4_ref, 1e-4)

    # -- config 5: ragged fallback path (L % Cout != 0 and tail truncation) ---
    #    W=50, P=3 (embed_dim=16) -> L=66, 66 % 4 != 0
    sig5, chans5, P5 = 50, 4, 3
    w5 = jax.random.normal(kw5, (chans5, 1, P5), jnp.float32)
    b5 = jax.random.normal(kb5, (chans5,), jnp.float32)
    x5 = jax.random.normal(kx3, (B, chans5, sig5), jnp.float32)
    y5 = jax.block_until_ready(downsampling_embed_forward(x5, w5, b5))
    y5_ref = jax.block_until_ready(ref_forward(x5, w5, b5))
    _check(y5, y5_ref, 1e-4)

    print("KERNEL_OK")
</pallas_src>

<mosaic_0001>
module attributes {stable_mosaic.version = 11 : i64} {
  func.func @_proj_kernel(%arg0: i32, %arg1: i32, %arg2: memref<1x16x16xf32, #tpu.memory_space<vmem>>, %arg3: memref<16x16xf32, #tpu.memory_space<vmem>>, %arg4: memref<16x1xf32, #tpu.memory_space<vmem>>, %arg5: memref<1x16x16xf32, #tpu.memory_space<vmem>>) attributes {dimension_semantics = [#tpu.dimension_semantics<parallel>, #tpu.dimension_semantics<parallel>], iteration_bounds = array<i64: 2, 1>, scalar_prefetch = 0 : i64, scratch_operands = 0 : i64, tpu.core_type = #tpu.core_type<tc>, window_params = [{transform_indices = @transform_0, window_bounds = array<i64: 1, 16, 16>}, {pipeline_mode = #tpu.pipeline_mode<synchronous>, transform_indices = @transform_1, window_bounds = array<i64: 16, 16>}, {pipeline_mode = #tpu.pipeline_mode<synchronous>, transform_indices = @transform_2, window_bounds = array<i64: 16, 1>}, {transform_indices = @transform_3, window_bounds = array<i64: 1, 16, 16>}]} {
    %c0 = arith.constant 0 : index
    %c0_0 = arith.constant 0 : index
    %0 = vector.load %arg3[%c0, %c0_0] : memref<16x16xf32, #tpu.memory_space<vmem>>, vector<16x16xf32>
    %c0_1 = arith.constant 0 : index
    %c0_2 = arith.constant 0 : index
    %c0_3 = arith.constant 0 : index
    %1 = vector.load %arg2[%c0_1, %c0_2, %c0_3] : memref<1x16x16xf32, #tpu.memory_space<vmem>>, vector<1x16x16xf32>
    %2 = vector.shape_cast %1 : vector<1x16x16xf32> to vector<16x16xf32>
    %cst = arith.constant dense<0.000000e+00> : vector<16x16xf32>
    %3 = tpu.matmul %0, %2, %cst {dimension_numbers = #tpu.dot_dimension_numbers<[1], [1], [0], [0], [0, 0, 1, 0], [], []>} : vector<16x16xf32>, vector<16x16xf32>, vector<16x16xf32> -> vector<16x16xf32>
    %c0_4 = arith.constant 0 : index
    %c0_5 = arith.constant 0 : index
    %4 = vector.load %arg4[%c0_4, %c0_5] : memref<16x1xf32, #tpu.memory_space<vmem>>, vector<16x1xf32>
    %5 = vector.broadcast %4 : vector<16x1xf32> to vector<16x16xf32>
    %6 = arith.addf %3, %5 : vector<16x16xf32>
    %c0_6 = arith.constant 0 : index
    %c0_7 = arith.constant 0 : index
    %c0_8 = arith.constant 0 : index
    %7 = vector.load %arg5[%c0_6, %c0_7, %c0_8] : memref<1x16x16xf32, #tpu.memory_space<vmem>>, vector<1x16x16xf32>
    %8 = vector.shape_cast %7 : vector<1x16x16xf32> to vector<16x16xf32>
    %9 = vector.shape_cast %6 : vector<16x16xf32> to vector<1x16x16xf32>
    tpu.vector_store %arg5[%c0_6, %c0_7, %c0_8], %9 {strides = array<i32>} : memref<1x16x16xf32, #tpu.memory_space<vmem>>, vector<1x16x16xf32>,
    return
  }
  func.func @transform_0(%arg0: i32, %arg1: i32) -> (i32, i32, i32) {
    %c0_i32 = arith.constant 0 : i32
    %c0_i32_0 = arith.constant 0 : i32
    return %arg0, %arg1, %c0_i32 : i32, i32, i32
  }
  func.func @transform_1(%arg0: i32, %arg1: i32) -> (i32, i32) {
    %c0_i32 = arith.constant 0 : i32
    %c0_i32_0 = arith.constant 0 : i32
    %c0_i32_1 = arith.constant 0 : i32
    return %c0_i32, %c0_i32_0 : i32, i32
  }
  func.func @transform_2(%arg0: i32, %arg1: i32) -> (i32, i32) {
    %c0_i32 = arith.constant 0 : i32
    %c0_i32_0 = arith.constant 0 : i32
    %c0_i32_1 = arith.constant 0 : i32
    return %c0_i32, %c0_i32_0 : i32, i32
  }
  func.func @transform_3(%arg0: i32, %arg1: i32) -> (i32, i32, i32) {
    %c0_i32 = arith.constant 0 : i32
    %c0_i32_0 = arith.constant 0 : i32
    return %arg0, %c0_i32, %arg1 : i32, i32, i32
  }
}

</mosaic_0001>

<bundles_post_ra>
// kernel: tile.8
= control target key start
LH: loop header
LB: loop body
LE: loop exit
PB: predicated region body
PF: predicated region fallthrough
CT: control target
= control target key end

     0   :  { %s22_s0 = inlined_call_operand.vmem [shape: f32[4], index: 0, kind: input, shape index: {}]   ;;  %s23_s1 = inlined_call_operand.vmem [shape: f32[4,4], index: 1, kind: output, shape index: {}]  }
   0x1   :  { %v4_v0 = vld [vmem:[%s22_s0] ss:$0 sm:$0xff] }
   0x2   :  { %5 = vst [vmem:[%s23_s1] sm:$0xf] %v4_v0 }

// kernel: tile.0
= control target key start
LH: loop header
LB: loop body
LE: loop exit
PB: predicated region body
PF: predicated region fallthrough
CT: control target
= control target key end

     0   :  { %s35_s8 = smov 125   ;;  %vm8_vm0 = vcmask 7168   ;;  %s36_s11 = smov 126   ;;  %s62_s0 = inlined_call_operand.vmem [shape: f32[4,4], index: 0, kind: input, shape index: {}]   ;;  %s63_s1 = inlined_call_operand.vmem [shape: f32[16,1], index: 1, kind: output, shape index: {}]  }
   0x1   :  { %v5_v0 = vld [vmem:[%s62_s0] sm:$0xf]  ;;  %s34_s0 = smov 127  }
   0x2   :  { %6 = vst [vmem:[#allocation0] sm:$0xf] %v5_v0 }
   0x9   :  { %v10_v1 = vld [vmem:[#allocation0] sm:$0xf]  }
   0xa   :  { %v22_v2 = vld [vmem:[#allocation0] sm:$0xf]   ;;  %11 = vrot.lane.b32.xlu0 %v10_v1, %s34_s0 }
   0xb   :  { %23 = vrot.lane.b32.xlu1 %v22_v2, %s35_s8  ;;  %v7_v3 = vld [vmem:[#allocation0] sm:$0xf]  }
   0xc   :  { %v16_v4 = vld [vmem:[#allocation0] sm:$0xf]   ;;  %9 = vst.msk [vmem:[%s63_s1] ss:$4 sm:$0xf] %vm8_vm0, %v7_v3  }
   0xe   :  { %17 = vrot.lane.b32.xlu0 %v16_v4, %s36_s11 }
  0x7c   :  { %v12_v5 = vpop.permute.xlu0 %11  }
  0x7d   :  { %v24_v6 = vpop.permute.xlu1 %23   ;;  %28 = vst.msk [vmem:[%s63_s1 + $0x1] ss:$4 sm:$0xf] %vm8_vm0, %v12_v5  }
  0x7e   :  { %30 = vst.msk [vmem:[%s63_s1 + $0x3] ss:$4 sm:$0xf] %vm8_vm0, %v24_v6  }
  0x80   :  { %v18_v7 = vpop.permute.xlu0 %17  }
  0x81   :  { %29 = vst.msk [vmem:[%s63_s1 + $0x2] ss:$4 sm:$0xf] %vm8_vm0, %v18_v7  }

// kernel: downsampling_embed_forward.1
= control target key start
LH: loop header
LB: loop body
LE: loop exit
PB: predicated region body
PF: predicated region fallthrough
CT: control target
= control target key end

     0   :  { %s495_s12 = smov 0   ;;  %s497_s13 = smov 0   ;;  %s548_s0 = inlined_call_operand.vmem [shape: f32[2,16,16], index: 0, kind: input, shape index: {}]   ;;  %s549_s1 = inlined_call_operand.vmem [shape: f32[16,16], index: 1, kind: input, shape index: {}]   ;;  %s550_s2 = inlined_call_operand.vmem [shape: f32[16,1], index: 2, kind: input, shape index: {}]   ;;  %s551_s3 = inlined_call_operand.vmem [shape: f32[2,16,16], index: 3, kind: output, shape index: {}]  }
   0x1   :  { %s499_s14 = smov 0  }
   0x2 LB: > { %s25_s15 = sadd.s32 1, %s468_s13  ;;  %p400_p0 = scmp.ge.s32.totalorder %s472_s14, 1  ;;  %s472_s14 = sphi %s499_s14, %s13_s14   ;;  %s468_s13 = sphi %s497_s13, %s553_s13   ;;  %s464_s12 = sphi %s495_s12, %s552_s12  }
   0x3   : > { %p27_p1 = scmp.ge.s32.totalorder %s25_s15, 2  ;;  %p158_p2 = scmp.lt.s32.totalorder %s472_s14, 3 }
   0x5   : > { %s555_s15 = smov (%p27_p1, %s25_s15), 0  ;;  %p159_p3 = pnand %p400_p0, %p158_p2 }
   0x6   : > { %p190_p4 = scmp.lt.s32.totalorder (!%p159_p3), %s464_s12, 1 }
   0x7   : > { %162 = sbr.rel (%p159_p3) target bundleno = 222 (0xde), region = 32 }
   0xc   : > { %vm223_vm0 = vcmask 130048   ;;  %v207_v0 = vld [vmem:[%s549_s1] sm:$0xff]  ;;  %v474_v2 = vmov 0   ;;  %s557_s12 = smov (!%p190_p4, %s464_s12), 1  ;;  %v212_v3 = vld [vmem:[%s550_s2 + $0x8] sm:$0xff] }
   0xd   : > { %v211_v1 = vld [vmem:[%s550_s2] sm:$0xff]  ;;  %421 = vmatprep.mubr.msk.f32.mxu0 %vm223_vm0, %v207_v0  ;;  %449 = vset.pattern.permute.xlu0 %v474_v2  ;;  %s411_s22 = sshll.u32 %s557_s12, 4  ;;  %v208_v6 = vld [vmem:[%s549_s1 + $0x8] sm:$0xff] }
   0xe   : > { %215 = vperm.xlu0 %449, %v211_v1   ;;  %s197_s25 = scalar_lea.vmem %s548_s0, %s411_s22  ;;  %s206_s30 = scalar_lea.vmem %s551_s3, %s411_s22 }
   0xf   : > { %v209_v4 = vld [vmem:[%s197_s25] sm:$0xff]  ;;  %v210_v5 = vld [vmem:[%s197_s25 + $0x8] sm:$0xff] }
  0x10   : > { %417 = vmatprep.subr.msk.mxu0 %vm223_vm0, %v210_v5 }
  0x11   : > { %418 = vmatpush3.xpose.msk.msra.mxu0 %vm223_vm0, %v210_v5 }
  0x12   : > { %220 = vperm.xlu0 %449, %v212_v3   ;;  %419 = vmatprep.subr.msk.mxu0 %vm223_vm0, %v209_v4 }
  0x15   : > { %420 = vmatpush3.xpose.msk.msra.mxu0 %vm223_vm0, %v209_v4 }
  0x18   : > { %422 = vmatmul.mubr.msk.f32.vlgmr.msra.gmra.mxu0 %vm223_vm0, %v208_v6 }
  0x89   : > { %v216_v7 = vpop.permute.xlu0 %215 }
  0x8d   : > { %v221_v8 = vpop.permute.xlu0 %220 }
  0xd8   : > { %v423_v9 = vpop.f32.mrf.mxu0 }
  0xd9   : > { %v308_v10 = vadd.f32 %v423_v9, %v221_v8 }
  0xda   : > { %v302_v11 = vpop.f32.mrf.mxu0 }
  0xdb   : > { %312 = vst.msk [vmem:[%s206_s30 + $0x8] sm:$0xff] %vm223_vm0, %v308_v10  ;;  %v303_v12 = vadd.f32 %v302_v11, %v216_v7 }
  0xdd   : > { %311 = vst.msk [vmem:[%s206_s30] sm:$0xff] %vm223_vm0, %v303_v12 }
  0xde PF: > { %s13_s14 = sadd.s32 1, %s472_s14   ;;  %s552_s12 = smov %s468_s13 }
  0xdf   : > { %p10_p5 = scmp.ge.s32.totalorder %s13_s14, 4   ;;  %s553_s13 = smov %s555_s15 }
  0xe1   :  { %12 = sbr.rel (!%p10_p5) target bundleno = 2 (0x2), region = 62 }

</bundles_post_ra>
